<compile_context>
chip_gen: v7x
topology: tpu7x:2x2x1
jax: 0.10.0
libtpu: 0.0.40
codegen_flags: <defaults>
</compile_context>

<pallas_src>
import functools

import jax
import jax.numpy as jnp
from jax import lax
from jax.experimental import pallas as pl
from jax.experimental.pallas import tpu as pltpu

LN_EPS = 1e-5  # nn.LayerNorm default


def _round_up(x, m):
    return (x + m - 1) // m * m


def _pick_b_tile(bs, n_pad, d, num_layers):
    """Pick the batch tile from a VMEM budget (safe on v5e/v6e/v7x)."""
    budget = 40 * 1024 * 1024          # ~40 MiB working set; fits v7x's 64 MiB VMEM
    lane_n = _round_up(n_pad, 128)
    lane_d = _round_up(d, 128)
    sub_n = _round_up(n_pad, 8)
    # double-buffered pipelined inputs (bf16 sym/feat, f32 aux) + f32 output
    pipelined = 2 * (sub_n * lane_n * 2 + sub_n * lane_d * 2
                     + 8 * lane_n * 4 + 8 * lane_d * 4)
    # f32 in-kernel temporaries: sym copy, feat, h/hc, keep (+ slack)
    temps = sub_n * lane_n * 4 + 5 * sub_n * lane_d * 4
    per_sample = pipelined + temps
    # param stacks (double-buffered): bf16 weights, f32 LN params / biases
    params = 2 * (num_layers * d * lane_d * 2 + 3 * num_layers * 8 * lane_d * 4
                  + d * lane_d * 2 + 8 * lane_d * 4)
    bt = max(1, (budget - params) // per_sample)
    # keep >= 2 grid blocks when the batch allows it (v7x 2nd TensorCore, less padding)
    bt = min(bt, max(1, (bs + 1) // 2))
    return int(bt)


# ---------------------------------------------------------------------------
# Fused kernel: one b_tile batch block per grid step, all layers + pool + fc.
# ---------------------------------------------------------------------------
def _gnn_kernel(sym_ref, feat_ref, aux_ref,
                w_ref, b_ref, g_ref, be_ref, fcw_ref, fcb_ref,
                out_ref, *, num_layers, n, n_pad, d, b_tile, has_mask):
    f32 = jnp.float32
    bf16 = jnp.bfloat16

    feat = feat_ref[...].astype(f32)                      # [B, n_pad, d] f32 working copy
    aux = aux_ref[...]                                    # [B, 2, n_pad] f32
    nodes_scaled = aux[:, 1, :][:, :, None]               # [B, n_pad, 1] (already * 1/n)

    # Hoist the mask broadcast out of the layer loop (done exactly once).
    if has_mask:
        keep = jnp.broadcast_to(aux[:, 0, :][:, :, None], (b_tile, n_pad, d))
    else:
        keep = None

    use_vpu_prop = n <= 32                                # MXU only pays off for large n
    if use_vpu_prop:
        sym = sym_ref[...].astype(f32)                    # [B, n_pad, n_pad] f32 for VPU
    else:
        sym = sym_ref[...]                                # bf16 MXU operand

    def one_layer(feat, w, b, g, be):
        # GraphConv propagation: (adj/2 + I) @ feat  (identity folded into sym).
        if use_vpu_prop:
            # VPU multiply-accumulate over the real node columns (padded cols are 0).
            h = sym[:, :, 0:1] * feat[:, 0:1, :]
            for j in range(1, n):
                h = h + sym[:, :, j:j + 1] * feat[:, j:j + 1, :]
        else:
            h = jnp.einsum('bij,bjd->bid', sym, feat.astype(bf16),
                           preferred_element_type=f32)
        # nn.Linear (pre-transposed weight): one big flattened MXU matmul.
        h2 = h.reshape(b_tile * n_pad, d)
        h2 = jnp.dot(h2.astype(bf16), w, preferred_element_type=f32) + b
        h = h2.reshape(b_tile, n_pad, d)
        # masked_fill_ BEFORE LayerNorm (keep == 0 on masked rows)
        if has_mask:
            h = h * keep
        # LayerNorm over embedding dim (f32, centered tensor reused)
        mean = jnp.mean(h, axis=-1, keepdims=True)
        hc = h - mean
        var = jnp.mean(hc * hc, axis=-1, keepdims=True)
        h = hc * lax.rsqrt(var + LN_EPS) * g + be
        # ReLU
        return jnp.maximum(h, 0.0)

    if num_layers <= 4:
        for l in range(num_layers):                       # static unroll, feat stays in VMEM
            feat = one_layer(feat, w_ref[l], b_ref[l], g_ref[l], be_ref[l])
    else:
        def body(l, f):
            return one_layer(f, w_ref[l], b_ref[l], g_ref[l], be_ref[l])
        feat = lax.fori_loop(0, num_layers, body, feat)

    # node-gated pool (torch .mean(dim=1): 1/n already folded into nodes_scaled), then fc
    pooled = jnp.sum(feat * nodes_scaled, axis=1)          # [B, d]
    out = jnp.dot(pooled.astype(bf16), fcw_ref[...],
                  preferred_element_type=f32) + fcb_ref[...]
    out_ref[...] = out[:, None, :]                         # [B, 1, d]


# ---------------------------------------------------------------------------
# Wrapper: glue (embedding gather, symmetrization, padding) + pallas_call
# ---------------------------------------------------------------------------
def gnn_forward(params, nodes, edges, ingredients, feat_mask=None, *, b_tile=None):
    emb, w_stack, b_stack, g_stack, beta_stack, fc_w_t, fc_b = params
    bs, n = ingredients.shape
    d = emb.shape[1]
    L = w_stack.shape[0]

    # Embedding lookup stays in plain JAX (data-dependent gather; no win in-kernel).
    feat = jnp.take(emb, ingredients, axis=0).astype(jnp.bfloat16)        # [bs, n, d]

    # Symmetrize + fold identity once outside the kernel; ship as bf16.
    e32 = edges.astype(jnp.float32)
    sym = (e32 + jnp.swapaxes(e32, 1, 2)) * 0.5 + jnp.eye(n, dtype=jnp.float32)
    sym = sym.astype(jnp.bfloat16)                                        # [bs, n, n]

    # keep = 1 - mask (multiplicative zero-fill) and nodes * 1/n, packed lane-dense.
    has_mask = feat_mask is not None
    keep = (1.0 - feat_mask.astype(jnp.float32)) if has_mask \
        else jnp.ones((bs, n), jnp.float32)
    nodes_scaled = nodes.astype(jnp.float32) * (1.0 / n)
    aux = jnp.stack([keep, nodes_scaled], axis=1)                         # [bs, 2, n]

    # Pad node axis to a sublane multiple so in-kernel reshapes are layout-free.
    n_pad = _round_up(n, 8)
    if n_pad != n:
        sym = jnp.pad(sym, ((0, 0), (0, n_pad - n), (0, n_pad - n)))
        feat = jnp.pad(feat, ((0, 0), (0, n_pad - n), (0, 0)))
        aux = jnp.pad(aux, ((0, 0), (0, 0), (0, n_pad - n)))

    # Batch tiling: VMEM-budgeted, >= 2 grid blocks when bs allows it.
    if b_tile is None:
        b_tile = _pick_b_tile(bs, n_pad, d, L)
    n_blocks = pl.cdiv(bs, b_tile)
    bs_pad = n_blocks * b_tile
    if bs_pad != bs:
        pad = bs_pad - bs
        sym = jnp.pad(sym, ((0, pad), (0, 0), (0, 0)))
        feat = jnp.pad(feat, ((0, pad), (0, 0), (0, 0)))
        aux = jnp.pad(aux, ((0, pad), (0, 0), (0, 0)))

    kernel = functools.partial(_gnn_kernel, num_layers=L, n=n, n_pad=n_pad,
                               d=d, b_tile=b_tile, has_mask=has_mask)
    # TODO(synk): params with constant index_maps could use pipeline_mode=pl.Buffered(1)
    # to drop their double buffer; negligible at these d/L so left at the default.
    out = pl.pallas_call(
        kernel,
        out_shape=jax.ShapeDtypeStruct((bs_pad, 1, d), jnp.float32),
        grid=(n_blocks,),
        in_specs=[
            pl.BlockSpec((b_tile, n_pad, n_pad), lambda i: (i, 0, 0)),   # sym (bf16)
            pl.BlockSpec((b_tile, n_pad, d), lambda i: (i, 0, 0)),       # feat (bf16)
            pl.BlockSpec((b_tile, 2, n_pad), lambda i: (i, 0, 0)),       # keep + nodes/n
            pl.BlockSpec((L, d, d), lambda i: (0, 0, 0)),                # layer W (pre-T, bf16)
            pl.BlockSpec((L, 1, d), lambda i: (0, 0, 0)),                # layer bias (f32)
            pl.BlockSpec((L, 1, d), lambda i: (0, 0, 0)),                # LN gamma (f32)
            pl.BlockSpec((L, 1, d), lambda i: (0, 0, 0)),                # LN beta (f32)
            pl.BlockSpec((d, d), lambda i: (0, 0)),                      # fc W (pre-T, bf16)
            pl.BlockSpec((1, d), lambda i: (0, 0)),                      # fc bias (f32)
        ],
        out_specs=pl.BlockSpec((b_tile, 1, d), lambda i: (i, 0, 0)),
        compiler_params=pltpu.CompilerParams(
            dimension_semantics=("parallel",),
            vmem_limit_bytes=48 * 1024 * 1024),
    )(sym, feat, aux,
      w_stack.astype(jnp.bfloat16), b_stack, g_stack, beta_stack,
      fc_w_t.astype(jnp.bfloat16), fc_b)
    return out[:bs, 0, :]


# ---------------------------------------------------------------------------
# Parameter initialization (mirrors the module's _reset_parameters)
# ---------------------------------------------------------------------------
def init_params(key, num_codes, embed_dim, num_layers):
    keys = jax.random.split(key, 2 + num_layers)
    # Embedding: trunc_normal_ on the first num_codes rows, padding row zeros.
    emb = jax.random.truncated_normal(
        keys[0], -2.0, 2.0, (num_codes, embed_dim), jnp.float32)
    emb = jnp.concatenate([emb, jnp.zeros((1, embed_dim), jnp.float32)], axis=0)

    limit = (6.0 / (embed_dim + embed_dim)) ** 0.5          # xavier_uniform_
    ws, bs_, gs, betas = [], [], [], []
    for l in range(num_layers):
        kw, kb = jax.random.split(keys[1 + l])
        w = jax.random.uniform(kw, (embed_dim, embed_dim), jnp.float32,
                               -limit, limit)               # [out, in]
        ws.append(w.T)                                      # pre-transposed [in, out]
        bs_.append(jax.random.normal(kb, (1, embed_dim), jnp.float32))
        gs.append(jnp.ones((1, embed_dim), jnp.float32))    # LayerNorm defaults
        betas.append(jnp.zeros((1, embed_dim), jnp.float32))
    w_stack = jnp.stack(ws)                                 # [L, d, d]
    b_stack = jnp.stack(bs_)                                # [L, 1, d]
    g_stack = jnp.stack(gs)                                 # [L, 1, d]
    beta_stack = jnp.stack(betas)                           # [L, 1, d]

    fc_w = jax.random.normal(keys[1 + num_layers],
                             (embed_dim, embed_dim), jnp.float32)   # normal_ init
    fc_w_t = fc_w.T                                         # pre-transposed [in, out]
    fc_b = jnp.zeros((1, embed_dim), jnp.float32)
    return emb, w_stack, b_stack, g_stack, beta_stack, fc_w_t, fc_b


if __name__ == "__main__":
    key = jax.random.PRNGKey(0)
    num_codes, embed_dim, num_layers = 10, 32, 2
    bs, n = 2, 8

    kp, ki, ke, kn, km = jax.random.split(key, 5)
    params = init_params(kp, num_codes, embed_dim, num_layers)

    ingredients = jax.random.randint(ki, (bs, n), 0, num_codes + 1)      # [bs, n]
    edges = jax.random.uniform(ke, (bs, n, n), jnp.float32)              # [bs, n, n]
    nodes = (jax.random.uniform(kn, (bs, n)) > 0.3).astype(jnp.float32)  # [bs, n]
    feat_mask = jax.random.uniform(km, (bs, n)) > 0.8                    # [bs, n] bool

    out = gnn_forward(params, nodes, edges, ingredients, feat_mask)
    jax.block_until_ready(out)
    assert out.shape == (bs, embed_dim)
    print("KERNEL_OK")
</pallas_src>

<mosaic_0001>
module attributes {stable_mosaic.version = 11 : i64} {
  func.func @_gnn_kernel(%arg0: i32, %arg1: memref<1x8x8xbf16, #tpu.memory_space<vmem>>, %arg2: memref<1x8x32xbf16, #tpu.memory_space<vmem>>, %arg3: memref<1x2x8xf32, #tpu.memory_space<vmem>>, %arg4: memref<2x32x32xbf16, #tpu.memory_space<vmem>>, %arg5: memref<2x1x32xf32, #tpu.memory_space<vmem>>, %arg6: memref<2x1x32xf32, #tpu.memory_space<vmem>>, %arg7: memref<2x1x32xf32, #tpu.memory_space<vmem>>, %arg8: memref<32x32xbf16, #tpu.memory_space<vmem>>, %arg9: memref<1x32xf32, #tpu.memory_space<vmem>>, %arg10: memref<1x1x32xf32, #tpu.memory_space<vmem>>) attributes {dimension_semantics = [#tpu.dimension_semantics<parallel>], iteration_bounds = array<i64: 2>, scalar_prefetch = 0 : i64, scratch_operands = 0 : i64, tpu.core_type = #tpu.core_type<tc>, window_params = [{transform_indices = @transform_0, window_bounds = array<i64: 1, 8, 8>}, {transform_indices = @transform_1, window_bounds = array<i64: 1, 8, 32>}, {transform_indices = @transform_2, window_bounds = array<i64: 1, 2, 8>}, {pipeline_mode = #tpu.pipeline_mode<synchronous>, transform_indices = @transform_3, window_bounds = array<i64: 2, 32, 32>}, {pipeline_mode = #tpu.pipeline_mode<synchronous>, transform_indices = @transform_4, window_bounds = array<i64: 2, 1, 32>}, {pipeline_mode = #tpu.pipeline_mode<synchronous>, transform_indices = @transform_5, window_bounds = array<i64: 2, 1, 32>}, {pipeline_mode = #tpu.pipeline_mode<synchronous>, transform_indices = @transform_6, window_bounds = array<i64: 2, 1, 32>}, {pipeline_mode = #tpu.pipeline_mode<synchronous>, transform_indices = @transform_7, window_bounds = array<i64: 32, 32>}, {pipeline_mode = #tpu.pipeline_mode<synchronous>, transform_indices = @transform_8, window_bounds = array<i64: 1, 32>}, {transform_indices = @transform_9, window_bounds = array<i64: 1, 1, 32>}]} {
    %c0 = arith.constant 0 : index
    %c0_0 = arith.constant 0 : index
    %c0_1 = arith.constant 0 : index
    %0 = vector.load %arg2[%c0, %c0_0, %c0_1] : memref<1x8x32xbf16, #tpu.memory_space<vmem>>, vector<1x8x32xbf16>
    %1 = arith.extf %0 : vector<1x8x32xbf16> to vector<1x8x32xf32>
    %c0_2 = arith.constant 0 : index
    %c0_3 = arith.constant 0 : index
    %c0_4 = arith.constant 0 : index
    %2 = vector.load %arg3[%c0_2, %c0_3, %c0_4] : memref<1x2x8xf32, #tpu.memory_space<vmem>>, vector<1x2x8xf32>
    %3 = vector.extract_strided_slice %2 {offsets = [0, 1, 0], sizes = [1, 1, 8], strides = [1, 1, 1]} : vector<1x2x8xf32> to vector<1x1x8xf32>
    %4 = vector.shape_cast %3 : vector<1x1x8xf32> to vector<1x8xf32>
    %5 = vector.shape_cast %4 : vector<1x8xf32> to vector<1x8x1xf32>
    %6 = vector.extract_strided_slice %2 {offsets = [0, 0, 0], sizes = [1, 1, 8], strides = [1, 1, 1]} : vector<1x2x8xf32> to vector<1x1x8xf32>
    %7 = vector.shape_cast %6 : vector<1x1x8xf32> to vector<1x8xf32>
    %8 = vector.shape_cast %7 : vector<1x8xf32> to vector<1x8x1xf32>
    %9 = vector.shape_cast %8 : vector<1x8x1xf32> to vector<1x8x1xf32>
    %10 = vector.broadcast %9 : vector<1x8x1xf32> to vector<1x8x32xf32>
    %c0_5 = arith.constant 0 : index
    %c0_6 = arith.constant 0 : index
    %c0_7 = arith.constant 0 : index
    %11 = vector.load %arg1[%c0_5, %c0_6, %c0_7] : memref<1x8x8xbf16, #tpu.memory_space<vmem>>, vector<1x8x8xbf16>
    %12 = arith.extf %11 : vector<1x8x8xbf16> to vector<1x8x8xf32>
    %c0_8 = arith.constant 0 : index
    %c0_9 = arith.constant 0 : index
    %c0_10 = arith.constant 0 : index
    %13 = vector.load %arg4[%c0_8, %c0_9, %c0_10] : memref<2x32x32xbf16, #tpu.memory_space<vmem>>, vector<1x32x32xbf16>
    %14 = vector.shape_cast %13 : vector<1x32x32xbf16> to vector<32x32xbf16>
    %c0_11 = arith.constant 0 : index
    %c0_12 = arith.constant 0 : index
    %c0_13 = arith.constant 0 : index
    %15 = vector.load %arg5[%c0_11, %c0_12, %c0_13] : memref<2x1x32xf32, #tpu.memory_space<vmem>>, vector<1x1x32xf32>
    %16 = vector.shape_cast %15 : vector<1x1x32xf32> to vector<1x32xf32>
    %c0_14 = arith.constant 0 : index
    %c0_15 = arith.constant 0 : index
    %c0_16 = arith.constant 0 : index
    %17 = vector.load %arg6[%c0_14, %c0_15, %c0_16] : memref<2x1x32xf32, #tpu.memory_space<vmem>>, vector<1x1x32xf32>
    %18 = vector.shape_cast %17 : vector<1x1x32xf32> to vector<1x32xf32>
    %c0_17 = arith.constant 0 : index
    %c0_18 = arith.constant 0 : index
    %c0_19 = arith.constant 0 : index
    %19 = vector.load %arg7[%c0_17, %c0_18, %c0_19] : memref<2x1x32xf32, #tpu.memory_space<vmem>>, vector<1x1x32xf32>
    %20 = vector.shape_cast %19 : vector<1x1x32xf32> to vector<1x32xf32>
    %21 = vector.extract_strided_slice %12 {offsets = [0, 0, 0], sizes = [1, 8, 1], strides = [1, 1, 1]} : vector<1x8x8xf32> to vector<1x8x1xf32>
    %22 = vector.extract_strided_slice %1 {offsets = [0, 0, 0], sizes = [1, 1, 32], strides = [1, 1, 1]} : vector<1x8x32xf32> to vector<1x1x32xf32>
    %23 = vector.broadcast %21 : vector<1x8x1xf32> to vector<1x8x32xf32>
    %24 = vector.broadcast %22 : vector<1x1x32xf32> to vector<1x8x32xf32>
    %25 = arith.mulf %23, %24 : vector<1x8x32xf32>
    %26 = vector.extract_strided_slice %12 {offsets = [0, 0, 1], sizes = [1, 8, 1], strides = [1, 1, 1]} : vector<1x8x8xf32> to vector<1x8x1xf32>
    %27 = vector.extract_strided_slice %1 {offsets = [0, 1, 0], sizes = [1, 1, 32], strides = [1, 1, 1]} : vector<1x8x32xf32> to vector<1x1x32xf32>
    %28 = vector.broadcast %26 : vector<1x8x1xf32> to vector<1x8x32xf32>
    %29 = vector.broadcast %27 : vector<1x1x32xf32> to vector<1x8x32xf32>
    %30 = arith.mulf %28, %29 : vector<1x8x32xf32>
    %31 = arith.addf %25, %30 : vector<1x8x32xf32>
    %32 = vector.extract_strided_slice %12 {offsets = [0, 0, 2], sizes = [1, 8, 1], strides = [1, 1, 1]} : vector<1x8x8xf32> to vector<1x8x1xf32>
    %33 = vector.extract_strided_slice %1 {offsets = [0, 2, 0], sizes = [1, 1, 32], strides = [1, 1, 1]} : vector<1x8x32xf32> to vector<1x1x32xf32>
    %34 = vector.broadcast %32 : vector<1x8x1xf32> to vector<1x8x32xf32>
    %35 = vector.broadcast %33 : vector<1x1x32xf32> to vector<1x8x32xf32>
    %36 = arith.mulf %34, %35 : vector<1x8x32xf32>
    %37 = arith.addf %31, %36 : vector<1x8x32xf32>
    %38 = vector.extract_strided_slice %12 {offsets = [0, 0, 3], sizes = [1, 8, 1], strides = [1, 1, 1]} : vector<1x8x8xf32> to vector<1x8x1xf32>
    %39 = vector.extract_strided_slice %1 {offsets = [0, 3, 0], sizes = [1, 1, 32], strides = [1, 1, 1]} : vector<1x8x32xf32> to vector<1x1x32xf32>
    %40 = vector.broadcast %38 : vector<1x8x1xf32> to vector<1x8x32xf32>
    %41 = vector.broadcast %39 : vector<1x1x32xf32> to vector<1x8x32xf32>
    %42 = arith.mulf %40, %41 : vector<1x8x32xf32>
    %43 = arith.addf %37, %42 : vector<1x8x32xf32>
    %44 = vector.extract_strided_slice %12 {offsets = [0, 0, 4], sizes = [1, 8, 1], strides = [1, 1, 1]} : vector<1x8x8xf32> to vector<1x8x1xf32>
    %45 = vector.extract_strided_slice %1 {offsets = [0, 4, 0], sizes = [1, 1, 32], strides = [1, 1, 1]} : vector<1x8x32xf32> to vector<1x1x32xf32>
    %46 = vector.broadcast %44 : vector<1x8x1xf32> to vector<1x8x32xf32>
    %47 = vector.broadcast %45 : vector<1x1x32xf32> to vector<1x8x32xf32>
    %48 = arith.mulf %46, %47 : vector<1x8x32xf32>
    %49 = arith.addf %43, %48 : vector<1x8x32xf32>
    %50 = vector.extract_strided_slice %12 {offsets = [0, 0, 5], sizes = [1, 8, 1], strides = [1, 1, 1]} : vector<1x8x8xf32> to vector<1x8x1xf32>
    %51 = vector.extract_strided_slice %1 {offsets = [0, 5, 0], sizes = [1, 1, 32], strides = [1, 1, 1]} : vector<1x8x32xf32> to vector<1x1x32xf32>
    %52 = vector.broadcast %50 : vector<1x8x1xf32> to vector<1x8x32xf32>
    %53 = vector.broadcast %51 : vector<1x1x32xf32> to vector<1x8x32xf32>
    %54 = arith.mulf %52, %53 : vector<1x8x32xf32>
    %55 = arith.addf %49, %54 : vector<1x8x32xf32>
    %56 = vector.extract_strided_slice %12 {offsets = [0, 0, 6], sizes = [1, 8, 1], strides = [1, 1, 1]} : vector<1x8x8xf32> to vector<1x8x1xf32>
    %57 = vector.extract_strided_slice %1 {offsets = [0, 6, 0], sizes = [1, 1, 32], strides = [1, 1, 1]} : vector<1x8x32xf32> to vector<1x1x32xf32>
    %58 = vector.broadcast %56 : vector<1x8x1xf32> to vector<1x8x32xf32>
    %59 = vector.broadcast %57 : vector<1x1x32xf32> to vector<1x8x32xf32>
    %60 = arith.mulf %58, %59 : vector<1x8x32xf32>
    %61 = arith.addf %55, %60 : vector<1x8x32xf32>
    %62 = vector.extract_strided_slice %12 {offsets = [0, 0, 7], sizes = [1, 8, 1], strides = [1, 1, 1]} : vector<1x8x8xf32> to vector<1x8x1xf32>
    %63 = vector.extract_strided_slice %1 {offsets = [0, 7, 0], sizes = [1, 1, 32], strides = [1, 1, 1]} : vector<1x8x32xf32> to vector<1x1x32xf32>
    %64 = vector.broadcast %62 : vector<1x8x1xf32> to vector<1x8x32xf32>
    %65 = vector.broadcast %63 : vector<1x1x32xf32> to vector<1x8x32xf32>
    %66 = arith.mulf %64, %65 : vector<1x8x32xf32>
    %67 = arith.addf %61, %66 : vector<1x8x32xf32>
    %68 = vector.shape_cast %67 : vector<1x8x32xf32> to vector<8x32xf32>
    %69 = arith.truncf %68 : vector<8x32xf32> to vector<8x32xbf16>
    %cst = arith.constant dense<0.000000e+00> : vector<8x32xf32>
    %70 = tpu.matmul %69, %14, %cst {dimension_numbers = #tpu.dot_dimension_numbers<[1], [0], [0], [1], [0, 0, 1, 1], [], []>} : vector<8x32xbf16>, vector<32x32xbf16>, vector<8x32xf32> -> vector<8x32xf32>
    %71 = vector.broadcast %16 : vector<1x32xf32> to vector<8x32xf32>
    %72 = arith.addf %70, %71 : vector<8x32xf32>
    %73 = vector.shape_cast %72 : vector<8x32xf32> to vector<1x8x32xf32>
    %74 = arith.mulf %73, %10 : vector<1x8x32xf32>
    %cst_20 = arith.constant dense<0.000000e+00> : vector<1x8xf32>
    %75 = vector.multi_reduction <add>, %74, %cst_20 [2] : vector<1x8x32xf32> to vector<1x8xf32>
    %76 = vector.shape_cast %75 : vector<1x8xf32> to vector<1x8x1xf32>
    %cst_21 = arith.constant 3.200000e+01 : f32
    %77 = vector.broadcast %cst_21 : f32 to vector<1x8x1xf32>
    %78 = arith.divf %76, %77 : vector<1x8x1xf32>
    %79 = vector.broadcast %78 : vector<1x8x1xf32> to vector<1x8x32xf32>
    %80 = arith.subf %74, %79 : vector<1x8x32xf32>
    %81 = arith.mulf %80, %80 : vector<1x8x32xf32>
    %cst_22 = arith.constant dense<0.000000e+00> : vector<1x8xf32>
    %82 = vector.multi_reduction <add>, %81, %cst_22 [2] : vector<1x8x32xf32> to vector<1x8xf32>
    %83 = vector.shape_cast %82 : vector<1x8xf32> to vector<1x8x1xf32>
    %cst_23 = arith.constant 3.200000e+01 : f32
    %84 = vector.broadcast %cst_23 : f32 to vector<1x8x1xf32>
    %85 = arith.divf %83, %84 : vector<1x8x1xf32>
    %cst_24 = arith.constant 9.99999974E-6 : f32
    %86 = vector.broadcast %cst_24 : f32 to vector<1x8x1xf32>
    %87 = arith.addf %85, %86 : vector<1x8x1xf32>
    %88 = math.rsqrt %87 : vector<1x8x1xf32>
    %89 = vector.broadcast %88 : vector<1x8x1xf32> to vector<1x8x32xf32>
    %90 = arith.mulf %80, %89 : vector<1x8x32xf32>
    %91 = vector.shape_cast %18 : vector<1x32xf32> to vector<1x1x32xf32>
    %92 = vector.broadcast %91 : vector<1x1x32xf32> to vector<1x8x32xf32>
    %93 = arith.mulf %90, %92 : vector<1x8x32xf32>
    %94 = vector.shape_cast %20 : vector<1x32xf32> to vector<1x1x32xf32>
    %95 = vector.broadcast %94 : vector<1x1x32xf32> to vector<1x8x32xf32>
    %96 = arith.addf %93, %95 : vector<1x8x32xf32>
    %cst_25 = arith.constant 0.000000e+00 : f32
    %97 = vector.broadcast %cst_25 : f32 to vector<1x8x32xf32>
    %98 = arith.maximumf %96, %97 : vector<1x8x32xf32>
    %c1 = arith.constant 1 : index
    %c0_26 = arith.constant 0 : index
    %c0_27 = arith.constant 0 : index
    %99 = vector.load %arg4[%c1, %c0_26, %c0_27] : memref<2x32x32xbf16, #tpu.memory_space<vmem>>, vector<1x32x32xbf16>
    %100 = vector.shape_cast %99 : vector<1x32x32xbf16> to vector<32x32xbf16>
    %c1_28 = arith.constant 1 : index
    %c0_29 = arith.constant 0 : index
    %c0_30 = arith.constant 0 : index
    %101 = vector.load %arg5[%c1_28, %c0_29, %c0_30] : memref<2x1x32xf32, #tpu.memory_space<vmem>>, vector<1x1x32xf32>
    %102 = vector.shape_cast %101 : vector<1x1x32xf32> to vector<1x32xf32>
    %c1_31 = arith.constant 1 : index
    %c0_32 = arith.constant 0 : index
    %c0_33 = arith.constant 0 : index
    %103 = vector.load %arg6[%c1_31, %c0_32, %c0_33] : memref<2x1x32xf32, #tpu.memory_space<vmem>>, vector<1x1x32xf32>
    %104 = vector.shape_cast %103 : vector<1x1x32xf32> to vector<1x32xf32>
    %c1_34 = arith.constant 1 : index
    %c0_35 = arith.constant 0 : index
    %c0_36 = arith.constant 0 : index
    %105 = vector.load %arg7[%c1_34, %c0_35, %c0_36] : memref<2x1x32xf32, #tpu.memory_space<vmem>>, vector<1x1x32xf32>
    %106 = vector.shape_cast %105 : vector<1x1x32xf32> to vector<1x32xf32>
    %107 = vector.extract_strided_slice %12 {offsets = [0, 0, 0], sizes = [1, 8, 1], strides = [1, 1, 1]} : vector<1x8x8xf32> to vector<1x8x1xf32>
    %108 = vector.extract_strided_slice %98 {offsets = [0, 0, 0], sizes = [1, 1, 32], strides = [1, 1, 1]} : vector<1x8x32xf32> to vector<1x1x32xf32>
    %109 = vector.broadcast %107 : vector<1x8x1xf32> to vector<1x8x32xf32>
    %110 = vector.broadcast %108 : vector<1x1x32xf32> to vector<1x8x32xf32>
    %111 = arith.mulf %109, %110 : vector<1x8x32xf32>
    %112 = vector.extract_strided_slice %12 {offsets = [0, 0, 1], sizes = [1, 8, 1], strides = [1, 1, 1]} : vector<1x8x8xf32> to vector<1x8x1xf32>
    %113 = vector.extract_strided_slice %98 {offsets = [0, 1, 0], sizes = [1, 1, 32], strides = [1, 1, 1]} : vector<1x8x32xf32> to vector<1x1x32xf32>
    %114 = vector.broadcast %112 : vector<1x8x1xf32> to vector<1x8x32xf32>
    %115 = vector.broadcast %113 : vector<1x1x32xf32> to vector<1x8x32xf32>
    %116 = arith.mulf %114, %115 : vector<1x8x32xf32>
    %117 = arith.addf %111, %116 : vector<1x8x32xf32>
    %118 = vector.extract_strided_slice %12 {offsets = [0, 0, 2], sizes = [1, 8, 1], strides = [1, 1, 1]} : vector<1x8x8xf32> to vector<1x8x1xf32>
    %119 = vector.extract_strided_slice %98 {offsets = [0, 2, 0], sizes = [1, 1, 32], strides = [1, 1, 1]} : vector<1x8x32xf32> to vector<1x1x32xf32>
    %120 = vector.broadcast %118 : vector<1x8x1xf32> to vector<1x8x32xf32>
    %121 = vector.broadcast %119 : vector<1x1x32xf32> to vector<1x8x32xf32>
    %122 = arith.mulf %120, %121 : vector<1x8x32xf32>
    %123 = arith.addf %117, %122 : vector<1x8x32xf32>
    %124 = vector.extract_strided_slice %12 {offsets = [0, 0, 3], sizes = [1, 8, 1], strides = [1, 1, 1]} : vector<1x8x8xf32> to vector<1x8x1xf32>
    %125 = vector.extract_strided_slice %98 {offsets = [0, 3, 0], sizes = [1, 1, 32], strides = [1, 1, 1]} : vector<1x8x32xf32> to vector<1x1x32xf32>
    %126 = vector.broadcast %124 : vector<1x8x1xf32> to vector<1x8x32xf32>
    %127 = vector.broadcast %125 : vector<1x1x32xf32> to vector<1x8x32xf32>
    %128 = arith.mulf %126, %127 : vector<1x8x32xf32>
    %129 = arith.addf %123, %128 : vector<1x8x32xf32>
    %130 = vector.extract_strided_slice %12 {offsets = [0, 0, 4], sizes = [1, 8, 1], strides = [1, 1, 1]} : vector<1x8x8xf32> to vector<1x8x1xf32>
    %131 = vector.extract_strided_slice %98 {offsets = [0, 4, 0], sizes = [1, 1, 32], strides = [1, 1, 1]} : vector<1x8x32xf32> to vector<1x1x32xf32>
    %132 = vector.broadcast %130 : vector<1x8x1xf32> to vector<1x8x32xf32>
    %133 = vector.broadcast %131 : vector<1x1x32xf32> to vector<1x8x32xf32>
    %134 = arith.mulf %132, %133 : vector<1x8x32xf32>
    %135 = arith.addf %129, %134 : vector<1x8x32xf32>
    %136 = vector.extract_strided_slice %12 {offsets = [0, 0, 5], sizes = [1, 8, 1], strides = [1, 1, 1]} : vector<1x8x8xf32> to vector<1x8x1xf32>
    %137 = vector.extract_strided_slice %98 {offsets = [0, 5, 0], sizes = [1, 1, 32], strides = [1, 1, 1]} : vector<1x8x32xf32> to vector<1x1x32xf32>
    %138 = vector.broadcast %136 : vector<1x8x1xf32> to vector<1x8x32xf32>
    %139 = vector.broadcast %137 : vector<1x1x32xf32> to vector<1x8x32xf32>
    %140 = arith.mulf %138, %139 : vector<1x8x32xf32>
    %141 = arith.addf %135, %140 : vector<1x8x32xf32>
    %142 = vector.extract_strided_slice %12 {offsets = [0, 0, 6], sizes = [1, 8, 1], strides = [1, 1, 1]} : vector<1x8x8xf32> to vector<1x8x1xf32>
    %143 = vector.extract_strided_slice %98 {offsets = [0, 6, 0], sizes = [1, 1, 32], strides = [1, 1, 1]} : vector<1x8x32xf32> to vector<1x1x32xf32>
    %144 = vector.broadcast %142 : vector<1x8x1xf32> to vector<1x8x32xf32>
    %145 = vector.broadcast %143 : vector<1x1x32xf32> to vector<1x8x32xf32>
    %146 = arith.mulf %144, %145 : vector<1x8x32xf32>
    %147 = arith.addf %141, %146 : vector<1x8x32xf32>
    %148 = vector.extract_strided_slice %12 {offsets = [0, 0, 7], sizes = [1, 8, 1], strides = [1, 1, 1]} : vector<1x8x8xf32> to vector<1x8x1xf32>
    %149 = vector.extract_strided_slice %98 {offsets = [0, 7, 0], sizes = [1, 1, 32], strides = [1, 1, 1]} : vector<1x8x32xf32> to vector<1x1x32xf32>
    %150 = vector.broadcast %148 : vector<1x8x1xf32> to vector<1x8x32xf32>
    %151 = vector.broadcast %149 : vector<1x1x32xf32> to vector<1x8x32xf32>
    %152 = arith.mulf %150, %151 : vector<1x8x32xf32>
    %153 = arith.addf %147, %152 : vector<1x8x32xf32>
    %154 = vector.shape_cast %153 : vector<1x8x32xf32> to vector<8x32xf32>
    %155 = arith.truncf %154 : vector<8x32xf32> to vector<8x32xbf16>
    %cst_37 = arith.constant dense<0.000000e+00> : vector<8x32xf32>
    %156 = tpu.matmul %155, %100, %cst_37 {dimension_numbers = #tpu.dot_dimension_numbers<[1], [0], [0], [1], [0, 0, 1, 1], [], []>} : vector<8x32xbf16>, vector<32x32xbf16>, vector<8x32xf32> -> vector<8x32xf32>
    %157 = vector.broadcast %102 : vector<1x32xf32> to vector<8x32xf32>
    %158 = arith.addf %156, %157 : vector<8x32xf32>
    %159 = vector.shape_cast %158 : vector<8x32xf32> to vector<1x8x32xf32>
    %160 = arith.mulf %159, %10 : vector<1x8x32xf32>
    %cst_38 = arith.constant dense<0.000000e+00> : vector<1x8xf32>
    %161 = vector.multi_reduction <add>, %160, %cst_38 [2] : vector<1x8x32xf32> to vector<1x8xf32>
    %162 = vector.shape_cast %161 : vector<1x8xf32> to vector<1x8x1xf32>
    %cst_39 = arith.constant 3.200000e+01 : f32
    %163 = vector.broadcast %cst_39 : f32 to vector<1x8x1xf32>
    %164 = arith.divf %162, %163 : vector<1x8x1xf32>
    %165 = vector.broadcast %164 : vector<1x8x1xf32> to vector<1x8x32xf32>
    %166 = arith.subf %160, %165 : vector<1x8x32xf32>
    %167 = arith.mulf %166, %166 : vector<1x8x32xf32>
    %cst_40 = arith.constant dense<0.000000e+00> : vector<1x8xf32>
    %168 = vector.multi_reduction <add>, %167, %cst_40 [2] : vector<1x8x32xf32> to vector<1x8xf32>
    %169 = vector.shape_cast %168 : vector<1x8xf32> to vector<1x8x1xf32>
    %cst_41 = arith.constant 3.200000e+01 : f32
    %170 = vector.broadcast %cst_41 : f32 to vector<1x8x1xf32>
    %171 = arith.divf %169, %170 : vector<1x8x1xf32>
    %cst_42 = arith.constant 9.99999974E-6 : f32
    %172 = vector.broadcast %cst_42 : f32 to vector<1x8x1xf32>
    %173 = arith.addf %171, %172 : vector<1x8x1xf32>
    %174 = math.rsqrt %173 : vector<1x8x1xf32>
    %175 = vector.broadcast %174 : vector<1x8x1xf32> to vector<1x8x32xf32>
    %176 = arith.mulf %166, %175 : vector<1x8x32xf32>
    %177 = vector.shape_cast %104 : vector<1x32xf32> to vector<1x1x32xf32>
    %178 = vector.broadcast %177 : vector<1x1x32xf32> to vector<1x8x32xf32>
    %179 = arith.mulf %176, %178 : vector<1x8x32xf32>
    %180 = vector.shape_cast %106 : vector<1x32xf32> to vector<1x1x32xf32>
    %181 = vector.broadcast %180 : vector<1x1x32xf32> to vector<1x8x32xf32>
    %182 = arith.addf %179, %181 : vector<1x8x32xf32>
    %cst_43 = arith.constant 0.000000e+00 : f32
    %183 = vector.broadcast %cst_43 : f32 to vector<1x8x32xf32>
    %184 = arith.maximumf %182, %183 : vector<1x8x32xf32>
    %185 = vector.broadcast %5 : vector<1x8x1xf32> to vector<1x8x32xf32>
    %186 = arith.mulf %184, %185 : vector<1x8x32xf32>
    %cst_44 = arith.constant dense<0.000000e+00> : vector<1x32xf32>
    %187 = vector.multi_reduction <add>, %186, %cst_44 [1] : vector<1x8x32xf32> to vector<1x32xf32>
    %188 = arith.truncf %187 : vector<1x32xf32> to vector<1x32xbf16>
    %c0_45 = arith.constant 0 : index
    %c0_46 = arith.constant 0 : index
    %189 = vector.load %arg8[%c0_45, %c0_46] : memref<32x32xbf16, #tpu.memory_space<vmem>>, vector<32x32xbf16>
    %cst_47 = arith.constant dense<0.000000e+00> : vector<1x32xf32>
    %190 = tpu.matmul %188, %189, %cst_47 {dimension_numbers = #tpu.dot_dimension_numbers<[1], [0], [0], [1], [0, 0, 1, 1], [], []>} : vector<1x32xbf16>, vector<32x32xbf16>, vector<1x32xf32> -> vector<1x32xf32>
    %c0_48 = arith.constant 0 : index
    %c0_49 = arith.constant 0 : index
    %191 = vector.load %arg9[%c0_48, %c0_49] : memref<1x32xf32, #tpu.memory_space<vmem>>, vector<1x32xf32>
    %192 = arith.addf %190, %191 : vector<1x32xf32>
    %193 = vector.shape_cast %192 : vector<1x32xf32> to vector<1x1x32xf32>
    %c0_50 = arith.constant 0 : index
    %c0_51 = arith.constant 0 : index
    %c0_52 = arith.constant 0 : index
    %194 = vector.load %arg10[%c0_50, %c0_51, %c0_52] : memref<1x1x32xf32, #tpu.memory_space<vmem>>, vector<1x1x32xf32>
    tpu.vector_store %arg10[%c0_50, %c0_51, %c0_52], %193 {strides = array<i32>} : memref<1x1x32xf32, #tpu.memory_space<vmem>>, vector<1x1x32xf32>,
    return
  }
  func.func @transform_0(%arg0: i32) -> (i32, i32, i32) {
    %c0_i32 = arith.constant 0 : i32
    %c0_i32_0 = arith.constant 0 : i32
    %c0_i32_1 = arith.constant 0 : i32
    return %arg0, %c0_i32, %c0_i32_0 : i32, i32, i32
  }
  func.func @transform_1(%arg0: i32) -> (i32, i32, i32) {
    %c0_i32 = arith.constant 0 : i32
    %c0_i32_0 = arith.constant 0 : i32
    %c0_i32_1 = arith.constant 0 : i32
    return %arg0, %c0_i32, %c0_i32_0 : i32, i32, i32
  }
  func.func @transform_2(%arg0: i32) -> (i32, i32, i32) {
    %c0_i32 = arith.constant 0 : i32
    %c0_i32_0 = arith.constant 0 : i32
    %c0_i32_1 = arith.constant 0 : i32
    return %arg0, %c0_i32, %c0_i32_0 : i32, i32, i32
  }
  func.func @transform_3(%arg0: i32) -> (i32, i32, i32) {
    %c0_i32 = arith.constant 0 : i32
    %c0_i32_0 = arith.constant 0 : i32
    %c0_i32_1 = arith.constant 0 : i32
    %c0_i32_2 = arith.constant 0 : i32
    return %c0_i32, %c0_i32_0, %c0_i32_1 : i32, i32, i32
  }
  func.func @transform_4(%arg0: i32) -> (i32, i32, i32) {
    %c0_i32 = arith.constant 0 : i32
    %c0_i32_0 = arith.constant 0 : i32
    %c0_i32_1 = arith.constant 0 : i32
    %c0_i32_2 = arith.constant 0 : i32
    return %c0_i32, %c0_i32_0, %c0_i32_1 : i32, i32, i32
  }
  func.func @transform_5(%arg0: i32) -> (i32, i32, i32) {
    %c0_i32 = arith.constant 0 : i32
    %c0_i32_0 = arith.constant 0 : i32
    %c0_i32_1 = arith.constant 0 : i32
    %c0_i32_2 = arith.constant 0 : i32
    return %c0_i32, %c0_i32_0, %c0_i32_1 : i32, i32, i32
  }
  func.func @transform_6(%arg0: i32) -> (i32, i32, i32) {
    %c0_i32 = arith.constant 0 : i32
    %c0_i32_0 = arith.constant 0 : i32
    %c0_i32_1 = arith.constant 0 : i32
    %c0_i32_2 = arith.constant 0 : i32
    return %c0_i32, %c0_i32_0, %c0_i32_1 : i32, i32, i32
  }
  func.func @transform_7(%arg0: i32) -> (i32, i32) {
    %c0_i32 = arith.constant 0 : i32
    %c0_i32_0 = arith.constant 0 : i32
    %c0_i32_1 = arith.constant 0 : i32
    return %c0_i32, %c0_i32_0 : i32, i32
  }
  func.func @transform_8(%arg0: i32) -> (i32, i32) {
    %c0_i32 = arith.constant 0 : i32
    %c0_i32_0 = arith.constant 0 : i32
    %c0_i32_1 = arith.constant 0 : i32
    return %c0_i32, %c0_i32_0 : i32, i32
  }
  func.func @transform_9(%arg0: i32) -> (i32, i32, i32) {
    %c0_i32 = arith.constant 0 : i32
    %c0_i32_0 = arith.constant 0 : i32
    %c0_i32_1 = arith.constant 0 : i32
    return %arg0, %c0_i32, %c0_i32_0 : i32, i32, i32
  }
}

</mosaic_0001>

<bundles_post_ra>
// kernel: tpu_custom_call.1
= control target key start
LH: loop header
LB: loop body
LE: loop exit
PB: predicated region body
PF: predicated region fallthrough
CT: control target
= control target key end

     0   :  { %s1710_s0 = inlined_call_operand.hbm [shape: bf16[2,8,8], index: 0, kind: input, shape index: {}]   ;;  %s1711_s1 = inlined_call_operand.hbm [shape: bf16[2,8,32], index: 1, kind: input, shape index: {}]   ;;  %s1712_s2 = inlined_call_operand.vmem [shape: f32[2,2,8], index: 2, kind: input, shape index: {}]   ;;  %s1713_s3 = inlined_call_operand.hbm [shape: bf16[2,32,32], index: 3, kind: input, shape index: {}]   ;;  %s1714_s4 = inlined_call_operand.vmem [shape: f32[2,1,32], index: 4, kind: input, shape index: {}]   ;;  %s1715_s5 = inlined_call_operand.vmem [shape: f32[2,1,32], index: 5, kind: input, shape index: {}]   ;;  %s1716_s6 = inlined_call_operand.vmem [shape: f32[2,1,32], index: 6, kind: input, shape index: {}]   ;;  %s1717_s7 = inlined_call_operand.vmem [shape: bf16[32,32], index: 7, kind: input, shape index: {}]   ;;  %s1718_s8 = inlined_call_operand.vmem [shape: f32[1,32], index: 8, kind: input, shape index: {}]   ;;  %s1719_s9 = inlined_call_operand.hbm [shape: f32[2,1,32], index: 9, kind: output, shape index: {}]  }
   0x1   :  { %1729 = sst [smem:[#allocation18_spill]] %s1713_s3 }
   0x2   :  { %14 = vsyncpa [#allocation3], 0 }
   0x3   :  { %16 = vsyncpa [#allocation3 + $0x1], 0 }
   0x4   :  { %17 = vsyncpa [#allocation6], 0 }
   0x5   :  { %19 = vsyncpa [#allocation6 + $0x1], 0 }
   0x6   :  { %20 = vsyncpa [#allocation4], 0 }
   0x7   :  { %22 = vsyncpa [#allocation4 + $0x1], 0  ;;  %s1348_s30 = smov 0   ;;  %s1350_s10 = smov 0  }
   0x8   :  { %s1352_s11 = smov 0   ;;  %s1354_s12 = smov 0  }
   0x9 LB: > { %1730 = sst [smem:[#allocation13_spill]] %s1268_s30  ;;  %s1369_s13 = sadd.s32 4294967295, %s1280_s12   ;;  %s1280_s12 = sphi %s1354_s12, %s1752_s12   ;;  %s1276_s11 = sphi %s1352_s11, %s1754_s11   ;;  %s1272_s10 = sphi %s1350_s10, %s1756_s10   ;;  %s1268_s30 = sphi %s1348_s30, %s1755_s30  }
   0xa   : > { %1731 = sst [smem:[#allocation14_spill]] %s1276_s11  ;;  %s958_s14 = sadd.s32 4294967294, %s1280_s12  }
   0xb   : > { %p48_p0 = scmp.ne.s32.totalorder %s1272_s10, %s1268_s30  ;;  %p1720_p1 = scmp.eq.s32.totalorder %s1369_s13, 0 }
   0xc   : > { %p256_p3 = scmp.eq.s32.totalorder %s958_s14, 1  ;;  %p959_p5 = scmp.ge.s32.totalorder %s1280_s12, 1 }
   0xd   : > { %p1378_p4 = por %p1720_p1, %p48_p0  ;;  %p263_p7 = scmp.lt.s32.totalorder %s1280_s12, 3 }
   0xe   : > { %p1383_p6 = por %p256_p3, %p48_p0  ;;  %s1282_s18 = smov [#allocation7]  }
   0xf   : > { %s1732_s15 = scalar_select %p1378_p4, 1, 0 }
  0x10   : > { %s1733_s16 = scalar_select %p1383_p6, 1, 0 }
  0x11   : > { %p1388_p8 = pnand %p959_p5, %p263_p7  ;;  %s275_s19 = sshll.u32 %s1282_s18, 4  ;;  %s1392_s19 = int_to_ptr.vmem [resolvable:$true] %s275_s19 }
  0x12   : > { %1734 = sst [smem:[#allocation15_spill]] %s1733_s16  ;;  %s1404_s21 = sadd.s32 1, %s1280_s12  }
  0x13   : > { %s1735_s17 = scalar_select %p1388_p8, 1, 0 }
  0x14   : > { %p1035_p9 = pneg %p1388_p8  ;;  %1737 = sst [smem:[#allocation16_spill]] %s1404_s21 }
  0x15   : > { %s35_s22 = sadd.s32 1, %s1276_s11  ;;  %s32_s23 = ssub.s32 %s1280_s12, %s1404_s21 }
  0x16   : > { %p1399_p11 = pnand %p1035_p9, %p1720_p1  ;;  %s1738_s3 = sld [smem:[#allocation18_spill]] }
  0x18   : > { %p1120_p13 = pneg %p1399_p11 }
  0x1c   : > { %s1118_s26 = scalar_lea.hbm %s1738_s3, 512 }
  0x1d   : > { %p1119_p12 = scmp.ne.s32.totalorder %s1738_s3, %s1118_s26  ;;  %p1125_p5 = scmp.lt.u32.totalorder %s1118_s26, %s1738_s3 }
  0x1f   : > { %p1121_p0 = pnand %p1120_p13, %p1119_p12 }
  0x21   : > { %p1122_p3 = pneg %p1121_p0 }
  0x23   : > { %p1127_p7 = pnand %p1125_p5, %p1122_p3 }
  0x25   : > { %1130 = shalt.err (!%p1127_p7)
}
  0x26   : > { %s1131_s18 = scalar_lea.vmem %s1392_s19, 512  ;;  %p1139_p2 = scmp.lt.s32.totalorder %s1392_s19, %s1392_s19 }
  0x27   : > { %p1132_p9 = scmp.ne.s32.totalorder %s1392_s19, %s1131_s18  ;;  %p1140_p6 = scmp.lt.s32.totalorder %s1131_s18, %s1131_s18 }
  0x29   : > { %p1134_p10 = pnand %p1132_p9, %p1120_p13  ;;  %p1141_p4 = por %p1140_p6, %p1139_p2 }
  0x2b   : > { %p1135_p1 = pneg %p1134_p10 }
  0x2d   : > { %p1142_p8 = pnand %p1141_p4, %p1135_p1 }
  0x2f   : > { %1145 = shalt.err (!%p1142_p8)
}
  0x30   : > { %s1283_s24 = smov 64   ;;  %s1284_s25 = smov 4  }
  0x31   : > { %1038 = dma.hbm_to_vmem [thread:$0]  (!%p1399_p11), %s1738_s3, 512, %s1392_s19, [#allocation6], %s1283_s24, %s1283_s24, %s1284_s25  }
  0x32   : > { %p33_p2 = scmp.eq.s32.totalorder %s32_s23, 0  ;;  %p42_p1 = scmp.ne.s32.totalorder %s1276_s11, %s1272_s10 }
  0x33   : > { %p43_p4 = scmp.eq.s32.totalorder %s1280_s12, 0  ;;  %p1051_p6 = scmp.lt.s32.totalorder %s1280_s12, 2 }
  0x34   : > { %s1435_s28 = scalar_select %p33_p2, %s1276_s11, %s35_s22  }
  0x35   : > { %p44_p8 = por %p43_p4, %p42_p1  ;;  %p1740_p10 = scmp.eq.s32.totalorder %s1369_s13, 1 }
  0x36   : > { %1739 = sst [smem:[#allocation17_spill]] %s1435_s28  ;;  %s304_s14 = sand.u32 1, %s1276_s11  }
  0x37   : > { %p1439_p12 = por %p1740_p10, %p42_p1  ;;  %s963_s18 = sshll.u32 %s1280_s12, 6 }
  0x38   : > { %s1445_s21 = sshll.u32 %s304_s14, 2  ;;  %s1450_s19 = scalar_lea.hbm %s1710_s0, %s963_s18 }
  0x39   : > { %s1741_s29 = scalar_select %p1439_p12, 1, 0 }
  0x3a   : > { %s308_s22 = scalar_lea.vmem [#allocation2], %s1445_s21  ;;  %p1453_p11 = pnand %p1051_p6, %p44_p8 }
  0x3b   : > { %s315_s23 = sshll.u32 %s308_s22, 4  ;;  %s1462_s16 = scalar_lea.hbm %s1711_s1, %s963_s18  ;;  %s1457_s23 = int_to_ptr.vmem [resolvable:$true] %s315_s23 }
  0x3c   : > { %s305_s27 = scalar_lea.sflag [#allocation3], %s304_s14  ;;  %s1146_s20 = scalar_lea.hbm %s1450_s19, 64 }
  0x3d   : > { %p1147_p13 = scmp.ne.s32.totalorder %s1450_s19, %s1146_s20  ;;  %p1148_p0 = pneg %p1453_p11 }
  0x3e   : > { %s1151_s28 = scalar_lea.hbm %s1710_s0, 128  ;;  %p1152_p7 = scmp.lt.u32.totalorder %s1450_s19, %s1710_s0 }
  0x3f   : > { %p1149_p3 = pnand %p1148_p0, %p1147_p13  ;;  %p1153_p9 = scmp.lt.u32.totalorder %s1151_s28, %s1146_s20 }
  0x40   : > { %p1155_p1 = scmp.lt.u32.totalorder %s1146_s20, %s1450_s19 }
  0x41   : > { %p1150_p5 = pneg %p1149_p3  ;;  %p1154_p2 = por %p1153_p9, %p1152_p7 }
  0x43   : > { %p1156_p4 = por %p1155_p1, %p1154_p2 }
  0x45   : > { %p1157_p6 = pnand %p1156_p4, %p1150_p5 }
  0x47   : > { %1160 = shalt.err (!%p1157_p6)
}
  0x48   : > { %s1161_s14 = scalar_lea.vmem %s1457_s23, 64  ;;  %s1285_s3 = smov [#allocation2]  }
  0x49   : > { %p1162_p8 = scmp.ne.s32.totalorder %s1457_s23, %s1161_s14  ;;  %s1166_s18 = sshll.u32 %s1285_s3, 4  ;;  %s1167_s18 = int_to_ptr.vmem [resolvable:$false] %s1166_s18 }
  0x4a   : > { %s1168_s30 = scalar_lea.vmem %s1167_s18, 128  ;;  %p1169_p3 = scmp.lt.s32.totalorder %s1457_s23, %s1167_s18 }
  0x4b   : > { %p1164_p10 = pnand %p1162_p8, %p1148_p0  ;;  %p1170_p7 = scmp.lt.s32.totalorder %s1168_s30, %s1161_s14 }
  0x4d   : > { %p1165_p13 = pneg %p1164_p10  ;;  %p1171_p9 = por %p1170_p7, %p1169_p3 }
  0x4f   : > { %p1172_p2 = pnand %p1171_p9, %p1165_p13 }
  0x51   : > { %1175 = shalt.err (!%p1172_p2)
}
  0x52   : > { %1042 = dma.hbm_to_vmem [thread:$0]  (!%p1453_p11), %s1450_s19, 64, %s1457_s23, %s305_s27  }
  0x53   : > { %s322_s11 = sand.u32 1, %s1280_s12   ;;  %s326_s28 = scalar_lea.vmem [#allocation5], %s1445_s21 }
  0x54   : > { %s333_s25 = sshll.u32 %s326_s28, 4  ;;  %s323_s26 = scalar_lea.sflag [#allocation6], %s322_s11  ;;  %s334_s25 = int_to_ptr.vmem [resolvable:$true] %s333_s25 }
  0x55   : > { %s1176_s20 = scalar_lea.hbm %s1462_s16, 64  ;;  %s1181_s3 = scalar_lea.hbm %s1711_s1, 128 }
  0x56   : > { %p1177_p5 = scmp.ne.s32.totalorder %s1462_s16, %s1176_s20  ;;  %p1182_p6 = scmp.lt.u32.totalorder %s1462_s16, %s1711_s1 }
  0x57   : > { %p1183_p8 = scmp.lt.u32.totalorder %s1181_s3, %s1176_s20  ;;  %p1185_p13 = scmp.lt.u32.totalorder %s1176_s20, %s1462_s16 }
  0x58   : > { %p1179_p1 = pnand %p1177_p5, %p1148_p0 }
  0x59   : > { %p1184_p10 = por %p1183_p8, %p1182_p6 }
  0x5a   : > { %p1180_p4 = pneg %p1179_p1 }
  0x5b   : > { %p1186_p3 = por %p1185_p13, %p1184_p10 }
  0x5d   : > { %p1187_p7 = pnand %p1186_p3, %p1180_p4 }
  0x5f   : > { %1190 = shalt.err (!%p1187_p7)
}
  0x60   : > { %s1191_s21 = scalar_lea.vmem %s334_s25, 64  ;;  %s1286_s19 = smov [#allocation5]  }
  0x61   : > { %p1192_p9 = scmp.ne.s32.totalorder %s334_s25, %s1191_s21  ;;  %s1196_s23 = sshll.u32 %s1286_s19, 4  ;;  %s1197_s23 = int_to_ptr.vmem [resolvable:$false] %s1196_s23 }
  0x62   : > { %s1198_s27 = scalar_lea.vmem %s1197_s23, 128  ;;  %p1199_p1 = scmp.lt.s32.totalorder %s334_s25, %s1197_s23 }
  0x63   : > { %p1194_p2 = pnand %p1192_p9, %p1148_p0  ;;  %p1200_p12 = scmp.lt.s32.totalorder %s1198_s27, %s1191_s21 }
  0x65   : > { %p1195_p5 = pneg %p1194_p2  ;;  %p1201_p6 = por %p1200_p12, %p1199_p1 }
  0x67   : > { %p1202_p8 = pnand %p1201_p6, %p1195_p5 }
  0x69   : > { %1205 = shalt.err (!%p1202_p8)
}
  0x6a   : > { %1045 = dma.hbm_to_vmem [thread:$0]  (!%p1453_p11), %s1462_s16, 64, %s334_s25, %s323_s26  }
  0x6b   : > { %p1743_p4 = scmp.ne.s32.totalorder %s1735_s17, 0 }
  0x6c   : > { %s1513_s11 = sand.u32 (!%p1743_p4), 1, %s1272_s10   ;;  %p1744_p0 = scmp.ne.s32.totalorder (!%p1743_p4), %s1732_s15, 0 }
  0x6d   : > { %349 = sbr.rel (%p1743_p4) target bundleno = 1607 (0x647), region = 56  ;;  %s967_s28 = sshll.u32 (!%p1743_p4), %s1513_s11, 2 }
  0x6e   : > { %s352_s20 = scalar_lea.sflag (!%p1743_p4), [#allocation3], %s1513_s11  ;;  %s355_s22 = scalar_lea.vmem (!%p1743_p4), [#allocation2], %s967_s28 }
  0x74   : > { %1251 = dma.done.wait (%p1744_p0), %s352_s20, 64  }
  0x75   : > { %1253 = vsyncadd (%p1744_p0), %s352_s20, 4294967232  ;;  %s360_s24 = sand.u32 1, %s1369_s13   ;;  %s1522_s17 = scalar_lea.vmem [#allocation5], %s967_s28 }
  0x76   : > { %s361_s16 = scalar_lea.sflag [#allocation6], %s360_s24 }
  0x77   : > { %1255 = dma.done.wait (%p1744_p0), %s361_s16, 64  }
  0x78   : > { %1257 = vsyncadd (%p1744_p0), %s361_s16, 4294967232  ;;  %p1745_p12 = scmp.eq.s32.totalorder %s1369_s13, 0 }
  0x7a   : > { %1259 = dma.done.wait (%p1745_p12), [#allocation6], 512   ;;  %p1746_p11 = pmov %p1745_p12 }
  0x7b   : > { %v1287_v0 = vmov 2   ;;  %v1288_v1 = vmov 0   ;;  %v433_v2 = vld [vmem:[%s355_s22] sm:$0xf]  ;;  %v1289_v4 = vmov 3   ;;  %v1290_v5 = vmov 1  }
  0x7c   : > { %1261 = vsyncadd (%p1746_p11), [#allocation6], 4294966784  ;;  %1101 = vset.pattern.permute.xlu1 %v1287_v0  ;;  %1099 = vset.pattern.permute.xlu0 %v1288_v1  ;;  %v434_v3 = vunpack.c.l.bf16 %v433_v2  ;;  %v1291_v6 = vmov 4   ;;  %v1292_v7 = vmov 5   ;;  %v1293_v8 = vmov 6   ;;  %v1108_v10 = vld [vmem:[#allocation7] sm:$0xff]  }
  0x7d   : > { %v1294_v9 = vmov 7   ;;  %v1295_v11 = vmov 0.0   ;;  %v1109_v12 = vld [vmem:[#allocation7 + $0x8] sm:$0xff]   ;;  %v419_v13 = vlaneseq  ;;  %vm1296_vm0 = vmmov 0   ;;  %p411_p10 = scmp.lt.s32.totalorder %s1369_s13, 1  ;;  %s989_s30 = sshll.u32 %s1369_s13, 4 }
  0x7e   : > { %463 = vperm.xlu1 %1101, %v434_v3   ;;  %444 = vperm.xlu0 %1099, %v434_v3   ;;  %v416_v18 = vld [vmem:[%s1522_s17] sm:$0xf]  ;;  %vm541_vm1 = vcmask 261120   ;;  %v971_v59 = vld [vmem:[%s1714_s4] ss:$0 sm:$0xff]  ;;  %s410_s21 = scalar_lea.vmem [#allocation8], %s1513_s11  ;;  %s1666_s28 = scalar_lea.hbm %s1719_s9, %s989_s30 }
  0x7f   : > { %1001 = vmatprep.subr.bf16.mxu0 %v1295_v11  ;;  %1009 = vmatprep.subr.bf16.mxu1 %v1295_v11  ;;  %s412_s15 = scalar_select %p411_p10, %s1369_s13, 1  ;;  %v1542_v14 = vshrl.u32 %v419_v13, 7  ;;  %v417_v22 = vunpack.c.l.bf16 %v416_v18  ;;  %vm833_vm2 = vcmask 253952  }
  0x80   : > { %1002 = vmatpush3.bf16.msra.mxu0 %v1108_v10  ;;  %1005 = vmatprep.mubr.msk.bf16.mxu0 %vm1296_vm0, %v1295_v11  ;;  %v1111_v10 = vld [vmem:[#allocation7 + $0x18] sm:$0xff]   ;;  %s848_s19 = sshll.u32 %s410_s21, 4  ;;  %s836_s13 = scalar_lea.sflag [#allocation4], %s1513_s11  ;;  %s1668_s19 = int_to_ptr.vmem [resolvable:$true] %s848_s19 }
  0x81   : > { %1003 = vmatprep.subr.bf16.mxu0 %v1295_v11  ;;  %1013 = vmatprep.mubr.msk.bf16.mxu1 %vm1296_vm0, %v1295_v11  ;;  %s970_s25 = sshll.u32 %s412_s15, 1  ;;  %v1545_v15 = vsub.s32 0, %v1542_v14  ;;  %v1556_v19 = vsub.s32 1, %v1542_v14  ;;  %v468_v20 = vsub.s32 2, %v1542_v14  ;;  %v478_v25 = vsub.s32 3, %v1542_v14  ;;  %s1206_s20 = scalar_lea.vmem %s1668_s19, 16 }
  0x82   : > { %1102 = vset.pattern.permute.xlu1 %v1289_v4  ;;  %1100 = vset.pattern.permute.xlu0 %v1290_v5  ;;  %s414_s3 = scalar_lea.vmem %s1712_s2, %s970_s25  ;;  %v488_v27 = vsub.s32 4, %v1542_v14  ;;  %v498_v31 = vsub.s32 5, %v1542_v14  ;;  %v508_v39 = vsub.s32 6, %v1542_v14  ;;  %v518_v48 = vsub.s32 7, %v1542_v14  ;;  %p1207_p13 = scmp.ne.s32.totalorder %s1668_s19, %s1206_s20 }
  0x83   : > { %473 = vperm.xlu1 %1102, %v434_v3   ;;  %453 = vperm.xlu0 %1100, %v434_v3   ;;  %v1550_v16 = vld [vmem:[%s414_s3] sm:$0x3]  ;;  %v450_v24 = vrot.slane %v417_v22, %v1545_v15  ;;  %v459_v26 = vrot.slane %v417_v22, %v1556_v19  ;;  %v469_v28 = vrot.slane %v417_v22, %v468_v20  ;;  %p1747_p3 = scmp.ne.s32.totalorder %s1741_s29, 0  ;;  %s1297_s22 = smov [#allocation8]  }
  0x84   : > { %1004 = vmatpush3.bf16.msra.mxu0 %v1109_v12  ;;  %v429_v17 = vrot.slane %v1550_v16, %v1545_v15  ;;  %v479_v33 = vrot.slane %v417_v22, %v478_v25  ;;  %v489_v35 = vrot.slane %v417_v22, %v488_v27  ;;  %v499_v38 = vrot.slane %v417_v22, %v498_v31  ;;  %s1210_s24 = sshll.u32 %s1297_s22, 4  ;;  %s1211_s24 = int_to_ptr.vmem [resolvable:$false] %s1210_s24 }
  0x85   : > { %1017 = vmatprep.subr.bf16.mxu0 %v1295_v11  ;;  %v509_v47 = vrot.slane %v417_v22, %v508_v39  ;;  %v519_v53 = vrot.slane %v417_v22, %v518_v48  ;;  %v975_v22 = vld [vmem:[%s1715_s5] ss:$0 sm:$0xff]  ;;  %p1208_p7 = pnand %p1207_p13, %p1747_p3  ;;  %s1212_s16 = scalar_lea.vmem %s1211_s24, 32 }
  0x86   : > { %p1213_p2 = scmp.lt.s32.totalorder %s1668_s19, %s1211_s24  ;;  %p1214_p5 = scmp.lt.s32.totalorder %s1212_s16, %s1206_s20 }
  0x87   : > { %1103 = vset.pattern.permute.xlu1 %v1291_v6  ;;  %1104 = vset.pattern.permute.xlu0 %v1292_v7  ;;  %p1209_p9 = pneg %p1208_p7 }
  0x88   : > { %483 = vperm.xlu1 %1103, %v434_v3   ;;  %493 = vperm.xlu0 %1104, %v434_v3   ;;  %p1215_p1 = por %p1214_p5, %p1213_p2 }
  0x8a   : > { %p1216_p6 = pnand %p1215_p1, %p1209_p9 }
  0x8c   : > { %1105 = vset.pattern.permute.xlu1 %v1293_v8  ;;  %1107 = vset.pattern.permute.xlu0 %v1294_v9 }
  0x8d   : > { %503 = vperm.xlu1 %1105, %v434_v3   ;;  %431 = vbcast.lane.b32.xlu0 %v429_v17, 256 }
  0x91   : > { %1106 = vset.pattern.permute.xlu1 %v1294_v9  ;;  %v1110_v9 = vld [vmem:[#allocation7 + $0x10] sm:$0xff]  }
  0x92   : > { %513 = vperm.xlu1 %1106, %v434_v3   ;;  %1010 = vmatpush3.bf16.msra.mxu1 %v1110_v9 }
  0x93   : > { %1011 = vmatprep.subr.bf16.mxu1 %v1295_v11 }
  0x96   : > { %1012 = vmatpush3.bf16.msra.mxu1 %v1111_v10 }
  0xfd   : > { %v1559_v21 = vpop.permute.xlu1 %463  ;;  %v1561_v23 = vpop.permute.xlu0 %444 }
  0xfe   : > { %v451_v32 = vmul.f32 %v450_v24, %v1561_v23  ;;  %v470_v36 = vmul.f32 %v469_v28, %v1559_v21 }
 0x102   : > { %v1569_v29 = vpop.permute.xlu1 %473  ;;  %v1571_v30 = vpop.permute.xlu0 %453 }
 0x103   : > { %v460_v34 = vmul.f32 %v459_v26, %v1571_v30  ;;  %v480_v40 = vmul.f32 %v479_v33, %v1569_v29  ;;  %v976_v26 = vld [vmem:[%s1716_s6] ss:$0 sm:$0xff] }
 0x105   : > { %v461_v37 = vadd.f32 %v460_v34, %v451_v32 }
 0x107   : > { %v471_v41 = vadd.f32 %v470_v36, %v461_v37  ;;  %v1585_v42 = vpop.permute.xlu1 %483  ;;  %v1587_v43 = vpop.permute.xlu0 %493 }
 0x108   : > { %v490_v44 = vmul.f32 %v489_v35, %v1585_v42  ;;  %v500_v46 = vmul.f32 %v499_v38, %v1587_v43 }
 0x109   : > { %v481_v45 = vadd.f32 %v480_v40, %v471_v41 }
 0x10b   : > { %v491_v49 = vadd.f32 %v490_v44, %v481_v45  ;;  %v432_v61 = vpop.permute.xlu0 %431 }
 0x10c   : > { %v1594_v50 = vpop.permute.xlu1 %503 }
 0x10d   : > { %v501_v51 = vadd.f32 %v500_v46, %v491_v49  ;;  %v510_v52 = vmul.f32 %v509_v47, %v1594_v50 }
 0x10f   : > { %v511_v55 = vadd.f32 %v510_v52, %v501_v51 }
 0x111   : > { %v514_v54 = vpop.permute.xlu1 %513 }
 0x112   : > { %v520_v56 = vmul.f32 %v519_v53, %v514_v54 }
 0x114   : > { %v521_v57 = vadd.f32 %v520_v56, %v511_v55 }
 0x116   : > { %v522_v58 = vpack.c.bf16 %v521_v57, %v521_v57 }
 0x118   : > { %1006 = vmatmul.mubr.msk.bf16.vlgmr.msra.gmra.mrb[0].mxu0 %vm541_vm1, %v522_v58 }
 0x119   : > { %1021 = vmatprep.mubr.msk.bf16.mxu0 %vm1296_vm0, %v1295_v11 }
 0x1eb   : > { %v579_v60 = vpop.f32.mrb[0].mxu0 }
 0x1ec   : > { %v580_v62 = vadd.f32 %v971_v59, %v579_v60  ;;  %v1007_v63 = vpop.f32.mrb[1].mxu0 }
 0x1ed   : > { %v582_v0 = vpop.f32.mrb[2].mxu0  ;;  %v1112_v63 = vld [vmem:[%s1717_s7] sm:$0xff]  }
 0x1ee   : > { %v585_v1 = vmul.f32 %v580_v62, %v432_v61  ;;  %v1008_v2 = vpop.f32.mrb[3].mxu0  ;;  %1018 = vmatpush3.bf16.msra.mxu0 %v1112_v63 }
 0x1ef   : > { %1019 = vmatprep.subr.bf16.mxu0 %v1295_v11  ;;  %v984_v2 = vld [vmem:[%s1715_s5 + $0x1] ss:$0 sm:$0xff] }
 0x1f0   : > { %v586_v3 = vsel %vm541_vm1, %v585_v1, 0.0 }
 0x1f1   : > { %587 = vadd.xlane.f32.xlu1 %v586_v3 }
 0x27e   : > { %v588_v4 = vpop.xlane.xlu1 %587 }
 0x27f   : > { %v590_v5 = vmul.f32 0.03125, %v588_v4  ;;  %v985_v4 = vld [vmem:[%s1716_s6 + $0x1] ss:$0 sm:$0xff] }
 0x281   : > { %v591_v6 = vsub.f32 %v585_v1, %v590_v5 }
 0x283   : > { %v592_v7 = vmul.f32 %v591_v6, %v591_v6 }
 0x285   : > { %v593_v8 = vsel %vm541_vm1, %v592_v7, 0.0 }
 0x286   : > { %594 = vadd.xlane.f32.xlu0 %v593_v8 }
 0x313   : > { %v595_v12 = vpop.xlane.xlu0 %594 }
 0x314   : > { %v596_v13 = vmul.f32 0.03125, %v595_v12 }
 0x316   : > { %v597_v17 = vadd.f32 1e-05, %v596_v13 }
 0x318   : > { %1114 = vrsqrt.f32 %v597_v17 }
 0x322   : > { %v1115_v18 = vpop.eup %1114 }
 0x323   : > { %v599_v24 = vmul.f32 %v1115_v18, %v591_v6 }
 0x325   : > { %v606_v28 = vmul.f32 %v975_v22, %v599_v24 }
 0x327   : > { %v613_v32 = vadd.f32 %v976_v26, %v606_v28  ;;  %v777_v26 = vld [vmem:[%s1718_s8] sm:$0x1] }
 0x329   : > { %v614_v33 = vmax.f32 %v613_v32, 0.0 }
 0x32b   : > { %v629_v34 = vrot.slane %v614_v33, %v1545_v15  ;;  %v634_v35 = vrot.slane %v614_v33, %v1556_v19  ;;  %v640_v36 = vrot.slane %v614_v33, %v468_v20  ;;  %v646_v40 = vrot.slane %v614_v33, %v478_v25 }
 0x32c   : > { %v652_v45 = vrot.slane %v614_v33, %v488_v27  ;;  %v658_v47 = vrot.slane %v614_v33, %v498_v31  ;;  %v980_v31 = vld [vmem:[%s1714_s4 + $0x1] ss:$0 sm:$0xff] }
 0x32d   : > { %v630_v37 = vmul.f32 %v629_v34, %v1561_v23  ;;  %v635_v38 = vmul.f32 %v634_v35, %v1571_v30  ;;  %v641_v44 = vmul.f32 %v640_v36, %v1559_v21  ;;  %v647_v15 = vmul.f32 %v646_v40, %v1569_v29 }
 0x32e   : > { %v653_v23 = vmul.f32 %v652_v45, %v1585_v42  ;;  %v664_v30 = vrot.slane %v614_v33, %v508_v39  ;;  %v659_v25 = vmul.f32 %v658_v47, %v1587_v43  ;;  %v670_v21 = vrot.slane %v614_v33, %v518_v48 }
 0x32f   : > { %v636_v41 = vadd.f32 %v635_v38, %v630_v37 }
 0x330   : > { %v665_v27 = vmul.f32 %v664_v30, %v1594_v50  ;;  %v671_v29 = vmul.f32 %v670_v21, %v514_v54  ;;  %v422_v50 = vrot.slane %v1550_v16, %v1556_v19 }
 0x331   : > { %v642_v46 = vadd.f32 %v641_v44, %v636_v41 }
 0x333   : > { %v648_v20 = vadd.f32 %v647_v15, %v642_v46 }
 0x335   : > { %v654_v49 = vadd.f32 %v653_v23, %v648_v20 }
 0x337   : > { %v660_v51 = vadd.f32 %v659_v25, %v654_v49 }
 0x339   : > { %v666_v52 = vadd.f32 %v665_v27, %v660_v51 }
 0x33b   : > { %v672_v53 = vadd.f32 %v671_v29, %v666_v52 }
 0x33d   : > { %v673_v55 = vpack.c.bf16 %v672_v53, %v672_v53 }
 0x33f   : > { %1014 = vmatmul.mubr.msk.bf16.vlgmr.msra.gmra.mrb[0].mxu1 %vm541_vm1, %v673_v55 }
 0x412   : > { %v729_v39 = vpop.f32.mrb[0].mxu1 }
 0x413   : > { %v730_v42 = vadd.f32 %v980_v31, %v729_v39  ;;  %v1015_v56 = vpop.f32.mrb[1].mxu1 }
 0x414   : > { %v732_v43 = vpop.f32.mrb[2].mxu1 }
 0x415   : > { %v1016_v57 = vpop.f32.mrb[3].mxu1  ;;  %v735_v14 = vmul.f32 %v730_v42, %v432_v61  ;;  %v1113_v61 = vld [vmem:[%s1717_s7 + $0x8] sm:$0xff]  }
 0x416   : > { %1020 = vmatpush3.bf16.msra.mxu0 %v1113_v61 }
 0x417   : > { %v736_v48 = vsel %vm541_vm1, %v735_v14, 0.0 }
 0x418   : > { %737 = vadd.xlane.f32.xlu0 %v736_v48 }
 0x42e   : > { %424 = vbcast.lane.b32.xlu0 %v422_v50, 256 }
 0x4a5   : > { %v738_v54 = vpop.xlane.xlu0 %737 }
 0x4a6   : > { %v739_v58 = vmul.f32 0.03125, %v738_v54 }
 0x4a8   : > { %v740_v59 = vsub.f32 %v735_v14, %v739_v58 }
 0x4a9   : > { %v425_v6 = vpop.permute.xlu0 %424 }
 0x4aa   : > { %v741_v60 = vmul.f32 %v740_v59, %v740_v59 }
 0x4ac   : > { %v742_v62 = vsel %vm541_vm1, %v741_v60, 0.0 }
 0x4ad   : > { %743 = vadd.xlane.f32.xlu1 %v742_v62 }
 0x53a   : > { %v744_v16 = vpop.xlane.xlu1 %743 }
 0x53b   : > { %v745_v19 = vmul.f32 0.03125, %v744_v16 }
 0x53d   : > { %v746_v0 = vadd.f32 1e-05, %v745_v19 }
 0x53f   : > { %1116 = vrsqrt.f32 %v746_v0 }
 0x549   : > { %v1117_v1 = vpop.eup %1116 }
 0x54a   : > { %v748_v3 = vmul.f32 %v1117_v1, %v740_v59 }
 0x54c   : > { %v755_v11 = vmul.f32 %v984_v2, %v748_v3 }
 0x54e   : > { %v762_v5 = vadd.f32 %v985_v4, %v755_v11 }
 0x550   : > { %v763_v7 = vmax.f32 %v762_v5, 0.0 }
 0x552   : > { %v764_v8 = vmul.f32 %v763_v7, %v425_v6 }
 0x554   : > { %v765_v9 = vsel %vm541_vm1, %v764_v8, 0.0 }
 0x555   : > { %v766_v10 = vrot.slane %v765_v9, 4 }
 0x557   : > { %v767_v12 = vadd.f32 %v766_v10, %v765_v9 }
 0x559   : > { %v768_v13 = vrot.slane %v767_v12, 2 }
 0x55b   : > { %v769_v17 = vadd.f32 %v768_v13, %v767_v12 }
 0x55d   : > { %v770_v18 = vrot.slane %v769_v17, 1 }
 0x55f   : > { %v771_v22 = vadd.f32 %v770_v18, %v769_v17 }
 0x561   : > { %v772_v24 = vpack.c.bf16 %v771_v22, %v771_v22 }
 0x563   : > { %1022 = vmatmul.mubr.msk.bf16.vlgmr.msra.gmra.mrb[4].mxu0 %vm541_vm1, %v772_v24 }
 0x636   : > { %v827_v28 = vpop.f32.mrb[4].mxu0 }
 0x637   : > { %v828_v32 = vadd.f32 %v827_v28, %v777_v26  ;;  %v1023_v33 = vpop.f32.mrb[5].mxu0 }
 0x638   : > { %v830_v34 = vpop.f32.mrb[6].mxu0 }
 0x639   : > { %v1024_v35 = vpop.f32.mrb[7].mxu0  ;;  %834 = vst.msk [vmem:[%s410_s21] sm:$0x1] %vm833_vm2, %v828_v32 }
 0x63a   : > { %1219 = shalt.err (!%p1216_p6)
}
 0x63b   : > { %s1220_s11 = scalar_lea.hbm %s1666_s28, 16  ;;  %s1224_s25 = scalar_lea.hbm %s1719_s9, 32 }
 0x63c   : > { %p1221_p8 = scmp.ne.s32.totalorder %s1666_s28, %s1220_s11  ;;  %p1225_p12 = scmp.lt.u32.totalorder %s1666_s28, %s1719_s9 }
 0x63d   : > { %p1226_p11 = scmp.lt.u32.totalorder %s1224_s25, %s1220_s11  ;;  %p1228_p13 = scmp.lt.u32.totalorder %s1220_s11, %s1666_s28 }
 0x63e   : > { %p1222_p4 = pnand %p1221_p8, %p1747_p3 }
 0x63f   : > { %p1227_p10 = por %p1226_p11, %p1225_p12 }
 0x640   : > { %p1223_p0 = pneg %p1222_p4 }
 0x641   : > { %p1229_p7 = por %p1228_p13, %p1227_p10 }
 0x643   : > { %p1230_p9 = pnand %p1229_p7, %p1223_p0 }
 0x645   : > { %1233 = shalt.err (!%p1230_p9)
}
 0x646   : > { %1033 = dma.vmem_to_hbm [thread:$0]  (%p1747_p3), %s1668_s19, 16, %s1666_s28, %s836_s13  }
 0x647 PF: > { %s1748_s3 = sld [smem:[#allocation13_spill]]  ;;  %s1749_s18 = sld [smem:[#allocation15_spill]] }
 0x648   : > { %p1751_p5 = scmp.ge.s32.totalorder %s1280_s12, 2 }
 0x64d   : > { %s860_s30 = sand.u32 1, %s1748_s3   ;;  %p1750_p2 = scmp.ne.s32.totalorder %s1749_s18, 0 }
 0x64e   : > { %s861_s21 = scalar_lea.sflag [#allocation4], %s860_s30 }
 0x64f   : > { %p1047_p1 = pnand %p1751_p5, %p1750_p2 }
 0x651   : > { %1263 = dma.done.wait (!%p1047_p1), %s861_s21, 16  }
 0x652   : > { %1265 = vsyncadd (!%p1047_p1), %s861_s21, 4294967280  ;;  %s1752_s12 = sld [smem:[#allocation16_spill]]  ;;  %s1753_s23 = sld [smem:[#allocation14_spill]] }
 0x653   : > { %s1754_s11 = sld [smem:[#allocation17_spill]]  ;;  %s1755_s30 = smov %s1272_s10 }
 0x658   : > { %p25_p6 = scmp.ge.s32.totalorder %s1752_s12, 4   ;;  %s1756_s10 = smov %s1753_s23 }
 0x65a   :  { %27 = sbr.rel (!%p25_p6) target bundleno = 9 (0x9), region = 125 }
 0x661   :  { %865 = vsyncpa [#allocation3], 1 }
 0x662   :  { %867 = vsyncpa [#allocation3 + $0x1], 1 }
 0x663   :  { %868 = vsyncpa [#allocation6], 1 }
 0x664   :  { %870 = vsyncpa [#allocation6 + $0x1], 1 }
 0x665   :  { %871 = vsyncpa [#allocation4], 1 }
 0x666   :  { %873 = vsyncpa [#allocation4 + $0x1], 1 }

</bundles_post_ra>
